<compile_context>
chip_gen: v7x
topology: tpu7x:2x2x1
jax: 0.10.0
libtpu: 0.0.40
codegen_flags: <defaults>
</compile_context>

<pallas_src>
import jax
import jax.numpy as jnp
from jax.experimental import pallas as pl
from jax.experimental.pallas import tpu as pltpu


def _round_up(x, m):
    return ((x + m - 1) // m) * m


def _patch_embed_kernel(p_ref, w_ref, b_ref, o_ref):
    # grid = (M_tiles, K_tiles); axis 1 is the (possibly size-1) reduction axis.
    @pl.when(pl.program_id(1) == 0)
    def _():
        o_ref[...] = jnp.zeros_like(o_ref)

    # bf16 operands on the MXU, f32 accumulation directly into the resident
    # f32 output tile (output block index is invariant along k, so it stays
    # in VMEM across the reduction — no extra scratch needed).
    o_ref[...] += jnp.dot(p_ref[...], w_ref[...],
                          preferred_element_type=jnp.float32)

    @pl.when(pl.program_id(1) == pl.num_programs(1) - 1)
    def _():
        o_ref[...] += b_ref[...]


def patch_embed_matmul(patches, w, b, *, tm_max=256, tk_tiled=512,
                       weight_resident_limit=8 * 1024 * 1024):
    """patches: [M, K] f32, w: [K, N] f32, b: [N] f32 -> [M, N] f32."""
    M, K = patches.shape
    _, N = w.shape

    # Pad N (lane dim) to a multiple of 128 for unmasked, lane-dense stores.
    Np = _round_up(max(N, 128), 128)

    # Keep the whole (bf16) weight resident in VMEM when it fits; otherwise
    # tile K and amortize the re-stream over the large M tile.
    Kp_min = _round_up(max(K, 128), 128)
    if Kp_min * Np * 2 <= weight_resident_limit:
        tk = Kp_min
        Kp = Kp_min
    else:
        tk = tk_tiled
        Kp = _round_up(K, tk)

    # Large M tile (fills MXU rows), clamped so tiny problems don't bloat.
    tm = min(tm_max, _round_up(max(M, 8), 8))
    Mp = _round_up(M, tm)

    # Zero-pad + cast operands (zero padding keeps the matmul exact).
    p_pad = jnp.zeros((Mp, Kp), jnp.bfloat16).at[:M, :K].set(
        patches.astype(jnp.bfloat16))
    w_pad = jnp.zeros((Kp, Np), jnp.bfloat16).at[:K, :N].set(
        w.astype(jnp.bfloat16))
    b_pad = jnp.zeros((1, Np), jnp.float32).at[0, :N].set(
        b.astype(jnp.float32))

    grid = (Mp // tm, Kp // tk)

    # VMEM budget: double-buffered patch tiles + (resident or double-buffered)
    # weight + resident f32 output tile + bias, with headroom.
    vmem_est = (2 * tm * tk * 2
                + (Kp * Np * 2 if grid[1] == 1 else 2 * tk * Np * 2)
                + 2 * tm * Np * 4
                + Np * 4)
    vmem_limit = int(min(max(2 * vmem_est, 32 * 1024 * 1024),
                         96 * 1024 * 1024))

    out = pl.pallas_call(
        _patch_embed_kernel,
        out_shape=jax.ShapeDtypeStruct((Mp, Np), jnp.float32),
        grid_spec=pltpu.PrefetchScalarGridSpec(
            num_scalar_prefetch=0,
            grid=grid,
            in_specs=[
                pl.BlockSpec((tm, tk), lambda i, k: (i, k)),   # patch tile
                pl.BlockSpec((tk, Np), lambda i, k: (k, 0)),   # weight (resident if grid[1]==1)
                pl.BlockSpec((1, Np), lambda i, k: (0, 0)),    # bias row
            ],
            out_specs=pl.BlockSpec((tm, Np), lambda i, k: (i, 0)),
        ),
        compiler_params=pltpu.CompilerParams(
            dimension_semantics=("parallel", "arbitrary"),
            vmem_limit_bytes=vmem_limit,
        ),
    )(p_pad, w_pad, b_pad)

    return out[:M, :N]


def patch_embed_forward(x, conv_w, conv_b, patch_size):
    """x: [B, C, H, W] (NCHW). conv_w: [E, C, ph, pw]. conv_b: [E].

    Returns [B, num_patches, E], matching
    PatchEmbed.forward = proj(x).flatten(2).transpose(1, 2).
    """
    B, C, H, W = x.shape
    ph, pw = patch_size
    E = conv_w.shape[0]
    gh, gw = H // ph, W // pw
    num_patches = gh * gw

    # Single fused reshape/transpose/reshape producing a K-contiguous [M, K]
    # layout; (C, ph, pw) flattening order matches the OIHW conv weight.
    xp = x.reshape(B, C, gh, ph, gw, pw)
    xp = jnp.transpose(xp, (0, 2, 4, 1, 3, 5))          # [B, gh, gw, C, ph, pw]
    patches = xp.reshape(B * num_patches, C * ph * pw)  # [M, K]

    w_mat = conv_w.reshape(E, C * ph * pw).T            # [K, E]

    out = patch_embed_matmul(patches, w_mat, conv_b)    # [M, E] f32
    return out.reshape(B, num_patches, E).astype(x.dtype)


if __name__ == "__main__":
    # Small, module-consistent shapes: B=2, in_chans=4, img 16x16, patch 8,
    # embed_dim=32 -> num_patches = (16//8)*(16//8) = 4, K = 4*8*8 = 256.
    B, C, H, W = 2, 4, 16, 16
    patch_size = (8, 8)
    embed_dim = 32

    key = jax.random.PRNGKey(0)
    kx, kw, kb = jax.random.split(key, 3)
    x = jax.random.normal(kx, (B, C, H, W), dtype=jnp.float32)
    conv_w = (
        jax.random.normal(kw, (embed_dim, C, patch_size[0], patch_size[1]),
                          dtype=jnp.float32) * 0.02
    )
    conv_b = jax.random.normal(kb, (embed_dim,), dtype=jnp.float32) * 0.02

    fwd = jax.jit(patch_embed_forward, static_argnums=(3,))
    out = fwd(x, conv_w, conv_b, patch_size)
    out = jax.block_until_ready(out)

    # Cross-check against a pure-JAX reference (strided conv == patch matmul).
    ref = jax.lax.conv_general_dilated(
        x, conv_w, window_strides=patch_size, padding="VALID",
        dimension_numbers=("NCHW", "OIHW", "NCHW"),
    )  # [B, E, gh, gw]
    ref = ref + conv_b[None, :, None, None]
    ref = ref.reshape(B, embed_dim, -1).transpose(0, 2, 1)  # [B, num_patches, E]
    assert out.shape == (B, (H // patch_size[0]) * (W // patch_size[1]), embed_dim)
    # bf16 MXU operands with f32 accumulation -> slightly looser tolerance.
    assert jnp.allclose(out, ref, atol=2e-2, rtol=2e-2)

    print("KERNEL_OK")
</pallas_src>

<mosaic_0001>
module attributes {stable_mosaic.version = 11 : i64} {
  func.func @_patch_embed_kernel(%arg0: i32, %arg1: i32, %arg2: memref<8x256xbf16, #tpu.memory_space<vmem>>, %arg3: memref<256x128xbf16, #tpu.memory_space<vmem>>, %arg4: memref<1x128xf32, #tpu.memory_space<vmem>>, %arg5: memref<8x128xf32, #tpu.memory_space<vmem>>) attributes {dimension_semantics = [#tpu.dimension_semantics<parallel>, #tpu.dimension_semantics<arbitrary>], iteration_bounds = array<i64: 1, 1>, scalar_prefetch = 0 : i64, scratch_operands = 0 : i64, tpu.core_type = #tpu.core_type<tc>, window_params = [{transform_indices = @transform_0, window_bounds = array<i64: 8, 256>}, {transform_indices = @transform_1, window_bounds = array<i64: 256, 128>}, {pipeline_mode = #tpu.pipeline_mode<synchronous>, transform_indices = @transform_2, window_bounds = array<i64: 1, 128>}, {transform_indices = @transform_3, window_bounds = array<i64: 8, 128>}]} {
    %c0_i32 = arith.constant 0 : i32
    %0 = arith.cmpi eq, %arg1, %c0_i32 : i32
    %1 = arith.extui %0 : i1 to i32
    %c0_i32_0 = arith.constant 0 : i32
    %2 = arith.cmpi ne, %1, %c0_i32_0 : i32
    scf.if %2 {
      %cst_10 = arith.constant 0.000000e+00 : f32
      %12 = vector.broadcast %cst_10 : f32 to vector<8x128xf32>
      %c0_11 = arith.constant 0 : index
      %c0_12 = arith.constant 0 : index
      %13 = vector.load %arg5[%c0_11, %c0_12] : memref<8x128xf32, #tpu.memory_space<vmem>>, vector<8x128xf32>
      tpu.vector_store %arg5[%c0_11, %c0_12], %12 {strides = array<i32>} : memref<8x128xf32, #tpu.memory_space<vmem>>, vector<8x128xf32>,
    } else {
    }
    %c0 = arith.constant 0 : index
    %c0_1 = arith.constant 0 : index
    %3 = vector.load %arg5[%c0, %c0_1] : memref<8x128xf32, #tpu.memory_space<vmem>>, vector<8x128xf32>
    %c0_2 = arith.constant 0 : index
    %c0_3 = arith.constant 0 : index
    %4 = vector.load %arg2[%c0_2, %c0_3] : memref<8x256xbf16, #tpu.memory_space<vmem>>, vector<8x256xbf16>
    %c0_4 = arith.constant 0 : index
    %c0_5 = arith.constant 0 : index
    %5 = vector.load %arg3[%c0_4, %c0_5] : memref<256x128xbf16, #tpu.memory_space<vmem>>, vector<256x128xbf16>
    %cst = arith.constant dense<0.000000e+00> : vector<8x128xf32>
    %6 = tpu.matmul %4, %5, %cst {dimension_numbers = #tpu.dot_dimension_numbers<[1], [0], [0], [1], [0, 0, 1, 1], [], []>} : vector<8x256xbf16>, vector<256x128xbf16>, vector<8x128xf32> -> vector<8x128xf32>
    %7 = arith.addf %3, %6 : vector<8x128xf32>
    %c0_6 = arith.constant 0 : index
    %c0_7 = arith.constant 0 : index
    %8 = vector.load %arg5[%c0_6, %c0_7] : memref<8x128xf32, #tpu.memory_space<vmem>>, vector<8x128xf32>
    tpu.vector_store %arg5[%c0_6, %c0_7], %7 {strides = array<i32>} : memref<8x128xf32, #tpu.memory_space<vmem>>, vector<8x128xf32>,
    %c0_i32_8 = arith.constant 0 : i32
    %9 = arith.cmpi eq, %arg1, %c0_i32_8 : i32
    %10 = arith.extui %9 : i1 to i32
    %c0_i32_9 = arith.constant 0 : i32
    %11 = arith.cmpi ne, %10, %c0_i32_9 : i32
    scf.if %11 {
      %c0_10 = arith.constant 0 : index
      %c0_11 = arith.constant 0 : index
      %12 = vector.load %arg5[%c0_10, %c0_11] : memref<8x128xf32, #tpu.memory_space<vmem>>, vector<8x128xf32>
      %c0_12 = arith.constant 0 : index
      %c0_13 = arith.constant 0 : index
      %13 = vector.load %arg4[%c0_12, %c0_13] : memref<1x128xf32, #tpu.memory_space<vmem>>, vector<1x128xf32>
      %14 = vector.broadcast %13 : vector<1x128xf32> to vector<8x128xf32>
      %15 = arith.addf %12, %14 : vector<8x128xf32>
      %c0_14 = arith.constant 0 : index
      %c0_15 = arith.constant 0 : index
      %16 = vector.load %arg5[%c0_14, %c0_15] : memref<8x128xf32, #tpu.memory_space<vmem>>, vector<8x128xf32>
      tpu.vector_store %arg5[%c0_14, %c0_15], %15 {strides = array<i32>} : memref<8x128xf32, #tpu.memory_space<vmem>>, vector<8x128xf32>,
    } else {
    }
    return
  }
  func.func @transform_0(%arg0: i32, %arg1: i32) -> (i32, i32) {
    %c0_i32 = arith.constant 0 : i32
    return %arg0, %arg1 : i32, i32
  }
  func.func @transform_1(%arg0: i32, %arg1: i32) -> (i32, i32) {
    %c0_i32 = arith.constant 0 : i32
    %c0_i32_0 = arith.constant 0 : i32
    return %arg1, %c0_i32 : i32, i32
  }
  func.func @transform_2(%arg0: i32, %arg1: i32) -> (i32, i32) {
    %c0_i32 = arith.constant 0 : i32
    %c0_i32_0 = arith.constant 0 : i32
    %c0_i32_1 = arith.constant 0 : i32
    return %c0_i32, %c0_i32_0 : i32, i32
  }
  func.func @transform_3(%arg0: i32, %arg1: i32) -> (i32, i32) {
    %c0_i32 = arith.constant 0 : i32
    %c0_i32_0 = arith.constant 0 : i32
    return %arg0, %c0_i32 : i32, i32
  }
}

</mosaic_0001>

<bundles_post_ra>
// kernel: patch_embed_forward.1
= control target key start
LH: loop header
LB: loop body
LE: loop exit
PB: predicated region body
PF: predicated region fallthrough
CT: control target
= control target key end

     0   :  { %s399_s0 = inlined_call_operand.vmem [shape: bf16[8,256], index: 0, kind: input, shape index: {}]   ;;  %s400_s1 = inlined_call_operand.vmem [shape: bf16[256,128], index: 1, kind: input, shape index: {}]   ;;  %s401_s2 = inlined_call_operand.vmem [shape: f32[1,128], index: 2, kind: input, shape index: {}]   ;;  %s402_s3 = inlined_call_operand.hbm [shape: f32[8,128], index: 3, kind: output, shape index: {}]  }
   0x1   :  { %v270_v0 = vld [vmem:[%s400_s1 + $0x40] sm:$0xff]   ;;  %v272_v2 = vld [vmem:[%s400_s1 + $0x48] sm:$0xff]   ;;  %v274_v4 = vld [vmem:[%s400_s1 + $0x50] sm:$0xff]  }
   0x2   :  { %v271_v1 = vld [vmem:[%s400_s1] sm:$0xff]   ;;  %246 = vmatprep.subr.bf16.mxu0 %v270_v0  ;;  %v273_v3 = vld [vmem:[%s400_s1 + $0x8] sm:$0xff]   ;;  %v275_v5 = vld [vmem:[%s400_s1 + $0x10] sm:$0xff]  }
   0x3   :  { %247 = vmatpush3.bf16.msra.mxu0 %v271_v1  ;;  %v276_v6 = vld [vmem:[%s400_s1 + $0x58] sm:$0xff]   ;;  %v278_v8 = vld [vmem:[%s400_s1 + $0x60] sm:$0xff]   ;;  %v280_v10 = vld [vmem:[%s400_s1 + $0x68] sm:$0xff]  }
   0x4   :  { %248 = vmatprep.subr.bf16.mxu0 %v272_v2  ;;  %v277_v7 = vld [vmem:[%s400_s1 + $0x18] sm:$0xff]   ;;  %v279_v9 = vld [vmem:[%s400_s1 + $0x20] sm:$0xff]  }
   0x5   :  { %v22_v11 = vld [vmem:[%s399_s0] sm:$0xff] }
   0x7   :  { %249 = vmatpush3.bf16.msra.mxu0 %v273_v3 }
   0x8   :  { %250 = vmatprep.subr.bf16.mxu0 %v274_v4 }
   0xb   :  { %251 = vmatpush3.bf16.msra.mxu0 %v275_v5 }
   0xc   :  { %252 = vmatprep.subr.bf16.mxu0 %v276_v6 }
   0xf   :  { %253 = vmatpush3.bf16.msra.mxu0 %v277_v7 }
  0x10   :  { %254 = vmatprep.subr.bf16.mxu0 %v278_v8 }
  0x11   :  { %8 = vsyncpa [#allocation3], 0  ;;  %v228_v12 = vcombine.high %v22_v11, %v22_v11  ;;  %v281_v13 = vld [vmem:[%s400_s1 + $0x28] sm:$0xff]   ;;  %v282_v14 = vld [vmem:[%s400_s1 + $0x70] sm:$0xff]   ;;  %v227_v18 = vcombine.low %v22_v11, %v22_v11  ;;  %s312_s20 = smov [#allocation2]  }
  0x12   :  { %v283_v15 = vld [vmem:[%s400_s1 + $0x30] sm:$0xff]   ;;  %v284_v16 = vld [vmem:[%s400_s1 + $0x78] sm:$0xff]   ;;  %v245_v24 = vld [vmem:[%s401_s2] ss:$0 sm:$0xff]  ;;  %s219_s21 = sshll.u32 %s312_s20, 4  ;;  %s220_s21 = int_to_ptr.vmem [resolvable:$true] %s219_s21 }
  0x13   :  { %255 = vmatpush3.bf16.msra.mxu0 %v279_v9  ;;  %190 = vmatprep.mubr.bf16.mxu0 %v228_v12  ;;  %v285_v17 = vld [vmem:[%s400_s1 + $0x38] sm:$0xff]   ;;  %s288_s22 = scalar_lea.vmem %s220_s21, 128  ;;  %p293_p1 = scmp.lt.s32.totalorder %s220_s21, %s220_s21 }
  0x14   :  { %256 = vmatprep.subr.bf16.mxu0 %v280_v10  ;;  %p289_p0 = scmp.ne.s32.totalorder %s220_s21, %s288_s22  ;;  %p294_p2 = scmp.lt.s32.totalorder %s288_s22, %s288_s22 }
  0x16   :  { %p295_p3 = por %p294_p2, %p293_p1 }
  0x17   :  { %257 = vmatpush3.bf16.msra.mxu0 %v281_v13 }
  0x18   :  { %258 = vmatprep.subr.bf16.mxu0 %v282_v14  ;;  %p296_p4 = pnand %p295_p3, %p289_p0 }
  0x1b   :  { %259 = vmatpush3.bf16.msra.mxu0 %v283_v15 }
  0x1c   :  { %260 = vmatprep.subr.bf16.mxu0 %v284_v16 }
  0x1f   :  { %261 = vmatpush3.bf16.msra.mxu0 %v285_v17 }
  0x22   :  { %191 = vmatmul.mubr.bf16.vlgmr.msra.gmra.mrb[0].mxu0 %v227_v18 }
  0xf5   :  { %v262_v19 = vpop.f32.mrb[0].mxu0 }
  0xf6   :  { %v263_v20 = vpop.f32.mrb[1].mxu0 }
  0xf7   :  { %v264_v21 = vadd.f32 %v263_v20, %v262_v19  ;;  %v265_v22 = vpop.f32.mrb[2].mxu0 }
  0xf8   :  { %v266_v23 = vpop.f32.mrb[3].mxu0 }
  0xf9   :  { %v211_v25 = vadd.f32 %v264_v21, %v245_v24 }
  0xfb   :  { %212 = vst [vmem:[#allocation2] sm:$0xff] %v211_v25 }
  0xfc   :  { %299 = shalt.err (!%p296_p4)
}
  0xfd   :  { %s300_s24 = scalar_lea.hbm %s402_s3, 128 }
  0xfe   :  { %p301_p5 = scmp.ne.s32.totalorder %s402_s3, %s300_s24  ;;  %p304_p6 = scmp.lt.u32.totalorder %s300_s24, %s402_s3 }
 0x100   :  { %p306_p7 = pnand %p304_p6, %p301_p5 }
 0x102   :  { %309 = shalt.err (!%p306_p7)
}
 0x103   :  { %222 = dma.vmem_to_hbm [thread:$0]  %s220_s21, 128, %s402_s3, [#allocation3]  }
 0x104   :  { %310 = dma.done.wait [#allocation3], 128  }
 0x105   :  { %311 = vsyncadd [#allocation3], 4294967168 }
 0x106   :  { %226 = vsyncpa [#allocation3], 1 }

</bundles_post_ra>
